<compile_context>
chip_gen: v7x
topology: tpu7x:2x2x1
jax: 0.10.0
libtpu: 0.0.40
codegen_flags: <defaults>
</compile_context>

<pallas_src>
import jax
import jax.numpy as jnp
from jax.experimental import pallas as pl
from jax.experimental.pallas import tpu as pltpu


def _round_up(n, m):
    return ((n + m - 1) // m) * m


def encoder_kernel(x_ref, w1_ref, b1_ref, alpha_ref, w2_ref, b2_ref, out_ref):
    # fc1: (TB, D) @ (D, H_pad) + (1, H_pad)
    h = jnp.dot(x_ref[...], w1_ref[...], preferred_element_type=jnp.float32)
    h = h + b1_ref[...]                       # broadcast (1, H_pad) over rows
    # PReLU with a single learnable slope (PyTorch default num_parameters=1),
    # read through the scalar (SMEM) path.
    # TODO(synk): a per-channel PReLU would need a (1, H_pad) VMEM slope tile.
    alpha = alpha_ref[0, 0]
    h = jnp.where(h > 0, h, alpha * h)
    # fc2 at the lane-padded width (full MXU columns), then store only the
    # true latent columns -> no padded writeback to HBM.
    y = jnp.dot(h, w2_ref[...], preferred_element_type=jnp.float32)
    y = y + b2_ref[...]
    latent = out_ref.shape[1]
    out_ref[...] = y[:, :latent].astype(out_ref.dtype)


def pad_encoder_params(w1, b1, w2, b2):
    """Pad hidden/latent dims to the 128-lane width ONCE, at parameter setup.

    Zero padding is exact: padded h columns are 0 and hit zero rows of the
    padded w2, so they contribute nothing; padded output columns are dropped
    in-kernel before the store.
    """
    hidden = w1.shape[1]
    latent = w2.shape[1]
    h_pad = _round_up(hidden, 128)
    l_pad = _round_up(latent, 128)
    if h_pad != hidden:
        w1 = jnp.pad(w1, ((0, 0), (0, h_pad - hidden)))
        b1 = jnp.pad(b1, ((0, 0), (0, h_pad - hidden)))
        w2 = jnp.pad(w2, ((0, h_pad - hidden), (0, 0)))
    if l_pad != latent:
        w2 = jnp.pad(w2, ((0, 0), (0, l_pad - latent)))
        b2 = jnp.pad(b2, ((0, 0), (0, l_pad - latent)))
    return w1, b1, w2, b2, latent


def encoder_forward(x, w1p, b1p, alpha, w2p, b2p, latent_dim, *, block_b=2048):
    """Fused Encoder forward: prelu(x @ W1 + b1) @ W2 + b2.

    w1p/b1p/w2p/b2p are the lane-padded parameters from pad_encoder_params.
    """
    B, D = x.shape
    H_pad = w1p.shape[1]
    L_pad = w2p.shape[1]
    L = latent_dim

    # Batch tile: multiple of 8 sublanes; no padding copy of x. The grid is
    # cdiv(B, tb); the ragged last tile's OOB rows are independent garbage
    # that is never written back.
    tb = min(block_b, _round_up(B, 8))
    if B > 8 and pl.cdiv(B, tb) < 2:
        # Ensure >= 2 grid steps so the "parallel" axis can shard across both
        # TensorCores on v7x (harmless on single-TC v5e/v6e).
        tb = _round_up(pl.cdiv(B, 2), 8)
    grid = (pl.cdiv(B, tb),)

    cost = pl.CostEstimate(
        flops=2 * B * (D * H_pad + H_pad * L_pad),
        transcendentals=0,
        bytes_accessed=4 * (B * D + w1p.size + b1p.size + w2p.size + b2p.size
                            + B * L),
    )

    out = pl.pallas_call(
        encoder_kernel,
        out_shape=jax.ShapeDtypeStruct((B, L), jnp.float32),
        grid_spec=pltpu.PrefetchScalarGridSpec(
            num_scalar_prefetch=0,
            grid=grid,
            in_specs=[
                pl.BlockSpec((tb, D), lambda i: (i, 0)),          # x: streamed
                pl.BlockSpec((D, H_pad), lambda i: (0, 0)),       # W1: resident
                pl.BlockSpec((1, H_pad), lambda i: (0, 0)),       # b1: resident
                pl.BlockSpec(memory_space=pltpu.MemorySpace.SMEM),  # alpha
                pl.BlockSpec((H_pad, L_pad), lambda i: (0, 0)),   # W2: resident
                pl.BlockSpec((1, L_pad), lambda i: (0, 0)),       # b2: resident
            ],
            out_specs=pl.BlockSpec((tb, L), lambda i: (i, 0)),    # true width
        ),
        compiler_params=pltpu.CompilerParams(
            dimension_semantics=("parallel",)),
        cost_estimate=cost,
    )(x, w1p, b1p, alpha, w2p, b2p)

    return out


def reference_forward(x, w1, b1, alpha, w2, b2):
    h = x @ w1 + b1
    h = jnp.where(h > 0, h, alpha[0, 0] * h)
    return h @ w2 + b2


if __name__ == "__main__":
    # Small shapes consistent with the module: x is (batch, input_dim).
    batch, input_dim, hidden_dim, latent_dim = 8, 32, 64, 16

    key = jax.random.PRNGKey(0)
    kx, kw1, kb1, kw2, kb2, kx2 = jax.random.split(key, 6)

    x = jax.random.normal(kx, (batch, input_dim), dtype=jnp.float32)

    # Deterministic parameter init (PyTorch-Linear-style uniform bounds).
    bound1 = 1.0 / jnp.sqrt(input_dim)
    w1 = jax.random.uniform(kw1, (input_dim, hidden_dim), jnp.float32,
                            -bound1, bound1)
    b1 = jax.random.uniform(kb1, (1, hidden_dim), jnp.float32, -bound1, bound1)

    bound2 = 1.0 / jnp.sqrt(hidden_dim)
    w2 = jax.random.uniform(kw2, (hidden_dim, latent_dim), jnp.float32,
                            -bound2, bound2)
    b2 = jax.random.uniform(kb2, (1, latent_dim), jnp.float32, -bound2, bound2)

    # PReLU default initial slope in PyTorch is 0.25 (single parameter).
    alpha = jnp.full((1, 1), 0.25, dtype=jnp.float32)

    # Pad parameters to the lane width ONCE (hoisted out of the forward path).
    w1p, b1p, w2p, b2p, L = pad_encoder_params(w1, b1, w2, b2)

    # --- small-batch check (single tile) ---
    out = encoder_forward(x, w1p, b1p, alpha, w2p, b2p, L)
    jax.block_until_ready(out)
    ref = reference_forward(x, w1, b1, alpha, w2, b2)
    assert out.shape == (batch, latent_dim)
    assert jnp.allclose(out, ref, atol=1e-4, rtol=1e-4)

    # --- larger, non-tile-multiple batch: exercises the multi-step grid
    #     (>=2 steps for v7x), the ragged final tile, and the unpadded
    #     (B, L) output path.
    big_batch = 1000
    x_big = jax.random.normal(kx2, (big_batch, input_dim), dtype=jnp.float32)
    out_big = encoder_forward(x_big, w1p, b1p, alpha, w2p, b2p, L)
    jax.block_until_ready(out_big)
    ref_big = reference_forward(x_big, w1, b1, alpha, w2, b2)
    assert out_big.shape == (big_batch, latent_dim)
    assert jnp.allclose(out_big, ref_big, atol=1e-4, rtol=1e-4)

    print("KERNEL_OK")
</pallas_src>

<mosaic_0001>
module attributes {stable_mosaic.version = 11 : i64} {
  func.func @encoder_kernel(%arg0: i32, %arg1: memref<8x32xf32, #tpu.memory_space<vmem>>, %arg2: memref<32x128xf32, #tpu.memory_space<vmem>>, %arg3: memref<1x128xf32, #tpu.memory_space<vmem>>, %arg4: memref<1x1xf32, #tpu.memory_space<smem>>, %arg5: memref<128x128xf32, #tpu.memory_space<vmem>>, %arg6: memref<1x128xf32, #tpu.memory_space<vmem>>, %arg7: memref<8x16xf32, #tpu.memory_space<vmem>>) attributes {dimension_semantics = [#tpu.dimension_semantics<parallel>], iteration_bounds = array<i64: 1>, scalar_prefetch = 0 : i64, scratch_operands = 0 : i64, tpu.core_type = #tpu.core_type<tc>, window_params = [{transform_indices = @transform_0, window_bounds = array<i64: 8, 32>}, {pipeline_mode = #tpu.pipeline_mode<synchronous>, transform_indices = @transform_1, window_bounds = array<i64: 32, 128>}, {pipeline_mode = #tpu.pipeline_mode<synchronous>, transform_indices = @transform_2, window_bounds = array<i64: 1, 128>}, {transform_indices = @transform_3, window_bounds = array<i64: 1, 1>}, {pipeline_mode = #tpu.pipeline_mode<synchronous>, transform_indices = @transform_4, window_bounds = array<i64: 128, 128>}, {pipeline_mode = #tpu.pipeline_mode<synchronous>, transform_indices = @transform_5, window_bounds = array<i64: 1, 128>}, {transform_indices = @transform_6, window_bounds = array<i64: 8, 16>}]} {
    %c0 = arith.constant 0 : index
    %c0_0 = arith.constant 0 : index
    %0 = vector.load %arg1[%c0, %c0_0] : memref<8x32xf32, #tpu.memory_space<vmem>>, vector<8x32xf32>
    %c0_1 = arith.constant 0 : index
    %c0_2 = arith.constant 0 : index
    %1 = vector.load %arg2[%c0_1, %c0_2] : memref<32x128xf32, #tpu.memory_space<vmem>>, vector<32x128xf32>
    %cst = arith.constant dense<0.000000e+00> : vector<8x128xf32>
    %2 = tpu.matmul %0, %1, %cst {dimension_numbers = #tpu.dot_dimension_numbers<[1], [0], [0], [1], [0, 0, 1, 1], [], []>} : vector<8x32xf32>, vector<32x128xf32>, vector<8x128xf32> -> vector<8x128xf32>
    %c0_3 = arith.constant 0 : index
    %c0_4 = arith.constant 0 : index
    %3 = vector.load %arg3[%c0_3, %c0_4] : memref<1x128xf32, #tpu.memory_space<vmem>>, vector<1x128xf32>
    %4 = vector.broadcast %3 : vector<1x128xf32> to vector<8x128xf32>
    %5 = arith.addf %2, %4 : vector<8x128xf32>
    %c0_5 = arith.constant 0 : index
    %c0_6 = arith.constant 0 : index
    %6 = memref.load %arg4[%c0_5, %c0_6] : memref<1x1xf32, #tpu.memory_space<smem>>
    %cst_7 = arith.constant 0.000000e+00 : f32
    %7 = vector.broadcast %cst_7 : f32 to vector<8x128xf32>
    %8 = arith.cmpf ogt, %5, %7 : vector<8x128xf32>
    %9 = vector.broadcast %6 : f32 to vector<8x128xf32>
    %10 = arith.mulf %9, %5 : vector<8x128xf32>
    %11 = arith.select %8, %5, %10 : vector<8x128xi1>, vector<8x128xf32>
    %c0_8 = arith.constant 0 : index
    %c0_9 = arith.constant 0 : index
    %12 = vector.load %arg5[%c0_8, %c0_9] : memref<128x128xf32, #tpu.memory_space<vmem>>, vector<128x128xf32>
    %cst_10 = arith.constant dense<0.000000e+00> : vector<8x128xf32>
    %13 = tpu.matmul %11, %12, %cst_10 {dimension_numbers = #tpu.dot_dimension_numbers<[1], [0], [0], [1], [0, 0, 1, 1], [], []>} : vector<8x128xf32>, vector<128x128xf32>, vector<8x128xf32> -> vector<8x128xf32>
    %c0_11 = arith.constant 0 : index
    %c0_12 = arith.constant 0 : index
    %14 = vector.load %arg6[%c0_11, %c0_12] : memref<1x128xf32, #tpu.memory_space<vmem>>, vector<1x128xf32>
    %15 = vector.broadcast %14 : vector<1x128xf32> to vector<8x128xf32>
    %16 = arith.addf %13, %15 : vector<8x128xf32>
    %17 = vector.extract_strided_slice %16 {offsets = [0, 0], sizes = [8, 16], strides = [1, 1]} : vector<8x128xf32> to vector<8x16xf32>
    %c0_13 = arith.constant 0 : index
    %c0_14 = arith.constant 0 : index
    %18 = vector.load %arg7[%c0_13, %c0_14] : memref<8x16xf32, #tpu.memory_space<vmem>>, vector<8x16xf32>
    tpu.vector_store %arg7[%c0_13, %c0_14], %17 {strides = array<i32>} : memref<8x16xf32, #tpu.memory_space<vmem>>, vector<8x16xf32>,
    return
  }
  func.func @transform_0(%arg0: i32) -> (i32, i32) {
    %c0_i32 = arith.constant 0 : i32
    %c0_i32_0 = arith.constant 0 : i32
    return %arg0, %c0_i32 : i32, i32
  }
  func.func @transform_1(%arg0: i32) -> (i32, i32) {
    %c0_i32 = arith.constant 0 : i32
    %c0_i32_0 = arith.constant 0 : i32
    %c0_i32_1 = arith.constant 0 : i32
    return %c0_i32, %c0_i32_0 : i32, i32
  }
  func.func @transform_2(%arg0: i32) -> (i32, i32) {
    %c0_i32 = arith.constant 0 : i32
    %c0_i32_0 = arith.constant 0 : i32
    %c0_i32_1 = arith.constant 0 : i32
    return %c0_i32, %c0_i32_0 : i32, i32
  }
  func.func @transform_3(%arg0: i32) -> (i32, i32) {
    %c0_i32 = arith.constant 0 : i32
    %c0_i32_0 = arith.constant 0 : i32
    %c0_i32_1 = arith.constant 0 : i32
    return %c0_i32, %c0_i32_0 : i32, i32
  }
  func.func @transform_4(%arg0: i32) -> (i32, i32) {
    %c0_i32 = arith.constant 0 : i32
    %c0_i32_0 = arith.constant 0 : i32
    %c0_i32_1 = arith.constant 0 : i32
    return %c0_i32, %c0_i32_0 : i32, i32
  }
  func.func @transform_5(%arg0: i32) -> (i32, i32) {
    %c0_i32 = arith.constant 0 : i32
    %c0_i32_0 = arith.constant 0 : i32
    %c0_i32_1 = arith.constant 0 : i32
    return %c0_i32, %c0_i32_0 : i32, i32
  }
  func.func @transform_6(%arg0: i32) -> (i32, i32) {
    %c0_i32 = arith.constant 0 : i32
    %c0_i32_0 = arith.constant 0 : i32
    return %arg0, %c0_i32 : i32, i32
  }
}

</mosaic_0001>

<bundles_post_ra>
// kernel: tpu_custom_call.1
= control target key start
LH: loop header
LB: loop body
LE: loop exit
PB: predicated region body
PF: predicated region fallthrough
CT: control target
= control target key end

     0   :  { %12 = vsyncpa [#allocation4], 0  ;;  %s577_s0 = inlined_call_operand.hbm [shape: f32[8,32], index: 0, kind: input, shape index: {}]   ;;  %s578_s1 = inlined_call_operand.hbm [shape: f32[32,128], index: 1, kind: input, shape index: {}]   ;;  %s579_s2 = inlined_call_operand.vmem [shape: f32[1,128], index: 2, kind: input, shape index: {}]   ;;  %s580_s3 = inlined_call_operand.<no memory space> [shape: f32[1,1], index: 3, kind: input, shape index: {}]   ;;  %s581_s4 = inlined_call_operand.hbm [shape: f32[128,128], index: 4, kind: input, shape index: {}]   ;;  %s582_s5 = inlined_call_operand.vmem [shape: f32[1,128], index: 5, kind: input, shape index: {}]   ;;  %s583_s6 = inlined_call_operand.hbm [shape: f32[8,16], index: 6, kind: output, shape index: {}]  }
   0x1   :  { %13 = vsyncpa [#allocation7], 0 }
   0x2   :  { %14 = vsyncpa [#allocation5], 0  ;;  %s470_s21 = smov [#allocation6]   ;;  %s376_s25 = scalar_lea.hbm %s578_s1, 512 }
   0x3   :  { %s30_s22 = sshll.u32 %s470_s21, 4  ;;  %p377_p0 = scmp.ne.s32.totalorder %s578_s1, %s376_s25  ;;  %s31_s22 = int_to_ptr.vmem [resolvable:$true] %s30_s22 }
   0x4   :  { %p380_p1 = scmp.lt.u32.totalorder %s376_s25, %s578_s1 }
   0x6   :  { %p382_p2 = pnand %p380_p1, %p377_p0 }
   0x8   :  { %385 = shalt.err (!%p382_p2)
}
   0x9   :  { %s386_s30 = scalar_lea.vmem %s31_s22, 512  ;;  %p391_p4 = scmp.lt.s32.totalorder %s31_s22, %s31_s22 }
   0xa   :  { %p387_p3 = scmp.ne.s32.totalorder %s31_s22, %s386_s30  ;;  %p392_p5 = scmp.lt.s32.totalorder %s386_s30, %s386_s30 }
   0xc   :  { %p393_p6 = por %p392_p5, %p391_p4 }
   0xe   :  { %p394_p7 = pnand %p393_p6, %p387_p3 }
  0x10   :  { %397 = shalt.err (!%p394_p7)
}
  0x11   :  { %s471_s7 = smov 128   ;;  %s472_s8 = smov 8  }
  0x12   :  { %36 = dma.hbm_to_vmem [thread:$0]  %s578_s1, 512, %s31_s22, [#allocation7], %s471_s7, %s471_s7, %s472_s8  }
  0x13   :  { %s473_s11 = smov [#allocation3]   ;;  %s474_s13 = smov [#allocation8]  }
  0x14   :  { %s21_s12 = sshll.u32 %s473_s11, 4  ;;  %s46_s14 = sshll.u32 %s474_s13, 4  ;;  %s22_s12 = int_to_ptr.vmem [resolvable:$true] %s21_s12  ;;  %s47_s14 = int_to_ptr.vmem [resolvable:$true] %s46_s14 }
  0x15   :  { %s398_s17 = scalar_lea.hbm %s577_s0, 128 }
  0x16   :  { %p399_p8 = scmp.ne.s32.totalorder %s577_s0, %s398_s17  ;;  %p402_p9 = scmp.lt.u32.totalorder %s398_s17, %s577_s0 }
  0x18   :  { %p404_p10 = pnand %p402_p9, %p399_p8 }
  0x1a   :  { %407 = shalt.err (!%p404_p10)
}
  0x1b   :  { %s408_s1 = scalar_lea.vmem %s22_s12, 128  ;;  %p413_p12 = scmp.lt.s32.totalorder %s22_s12, %s22_s12 }
  0x1c   :  { %p409_p11 = scmp.ne.s32.totalorder %s22_s12, %s408_s1  ;;  %p414_p13 = scmp.lt.s32.totalorder %s408_s1, %s408_s1 }
  0x1e   :  { %p415_p0 = por %p414_p13, %p413_p12 }
  0x20   :  { %p416_p1 = pnand %p415_p0, %p409_p11 }
  0x22   :  { %419 = shalt.err (!%p416_p1)
}
  0x23   :  { %24 = dma.hbm_to_vmem [thread:$0]  %s577_s0, 128, %s22_s12, [#allocation4]  }
  0x24   :  { %s420_s26 = scalar_lea.hbm %s581_s4, 2048 }
  0x25   :  { %p421_p2 = scmp.ne.s32.totalorder %s581_s4, %s420_s26  ;;  %p424_p3 = scmp.lt.u32.totalorder %s420_s26, %s581_s4 }
  0x27   :  { %p426_p4 = pnand %p424_p3, %p421_p2 }
  0x29   :  { %429 = shalt.err (!%p426_p4)
}
  0x2a   :  { %s430_s9 = scalar_lea.vmem %s47_s14, 2048  ;;  %p435_p6 = scmp.lt.s32.totalorder %s47_s14, %s47_s14 }
  0x2b   :  { %p431_p5 = scmp.ne.s32.totalorder %s47_s14, %s430_s9  ;;  %p436_p7 = scmp.lt.s32.totalorder %s430_s9, %s430_s9 }
  0x2d   :  { %p437_p8 = por %p436_p7, %p435_p6 }
  0x2f   :  { %p438_p9 = pnand %p437_p8, %p431_p5 }
  0x31   :  { %441 = shalt.err (!%p438_p9)
}
  0x32   :  { %52 = dma.hbm_to_vmem [thread:$0]  %s581_s4, 2048, %s47_s14, [#allocation7], %s471_s7, %s471_s7, %s472_s8  }
  0x33   :  { %464 = dma.done.wait [#allocation4], 128  }
  0x34   :  { %465 = vsyncadd [#allocation4], 4294967168 }
  0x35   :  { %466 = dma.done.wait [#allocation7], 2560  }
  0x36   :  { %467 = vsyncadd [#allocation7], 4294964736  ;;  %v475_v0 = vmov 0.0|0.0   ;;  %vm476_vm0 = vmmov 0   ;;  %v477_v1 = vmov 0.0   ;;  %v65_v2 = vld [vmem:[#allocation6] sm:$0xff]  ;;  %v152_v35 = vstv %s580_s3 }
  0x37   :  { %337 = vmatprep.subr.bf16.mxu0 %v475_v0  ;;  %299 = vmatprep.mubr.msk.f32.mxu0 %vm476_vm0, %v477_v1  ;;  %v66_v3 = vld [vmem:[#allocation6 + $0x8] sm:$0xff]  ;;  %v67_v4 = vld [vmem:[#allocation6 + $0x10] sm:$0xff]  ;;  %v68_v6 = vld [vmem:[#allocation6 + $0x18] sm:$0xff]  ;;  %vm76_vm1 = vcmask 261120   ;;  %s478_s14 = smov [#allocation9]   ;;  %vm248_vm3 = vcmask 130048  }
  0x38   :  { %343 = vmatprep.subr.bf16.mxu1 %v475_v0  ;;  %334 = vmatprep.mubr.msk.f32.mxu1 %vm476_vm0, %v477_v1  ;;  %v338_v5 = vpack.c.bf16 %v66_v3, %v65_v2  ;;  %v155_v7 = vld [vmem:[#allocation8] sm:$0xff]  ;;  %v156_v8 = vld [vmem:[#allocation8 + $0x8] sm:$0xff]  ;;  %v157_v9 = vld [vmem:[#allocation8 + $0x10] sm:$0xff]  ;;  %v341_v11 = vpack.c.bf16 %v68_v6, %v67_v4  ;;  %s256_s15 = sshll.u32 %s478_s14, 4  ;;  %s257_s15 = int_to_ptr.vmem [resolvable:$true] %s256_s15 }
  0x39   :  { %v158_v10 = vld [vmem:[#allocation8 + $0x18] sm:$0xff]  ;;  %v344_v12 = vpack.c.bf16 %v156_v8, %v155_v7  ;;  %v159_v14 = vld [vmem:[#allocation8 + $0x20] sm:$0xff]  ;;  %v160_v15 = vld [vmem:[#allocation8 + $0x28] sm:$0xff]  ;;  %p447_p11 = scmp.lt.s32.totalorder %s257_s15, %s257_s15 }
  0x3a   :  { %339 = vmatpush3.bf16.msra.mxu0 %v338_v5  ;;  %v347_v13 = vpack.c.bf16 %v158_v10, %v157_v9  ;;  %v64_v16 = vld [vmem:[#allocation3] sm:$0xff]  ;;  %v350_v17 = vpack.c.bf16 %v160_v15, %v159_v14  ;;  %v161_v18 = vld [vmem:[#allocation8 + $0x30] sm:$0xff]  ;;  %v163_v21 = vld [vmem:[#allocation8 + $0x40] sm:$0xff] }
  0x3b   :  { %340 = vmatprep.subr.bf16.mxu0 %v475_v0  ;;  %345 = vmatpush3.bf16.msra.mxu1 %v344_v12  ;;  %v162_v19 = vld [vmem:[#allocation8 + $0x38] sm:$0xff]  ;;  %v164_v22 = vld [vmem:[#allocation8 + $0x48] sm:$0xff]  ;;  %v165_v24 = vld [vmem:[#allocation8 + $0x50] sm:$0xff] }
  0x3c   :  { %346 = vmatprep.subr.bf16.mxu1 %v475_v0  ;;  %v353_v20 = vpack.c.bf16 %v162_v19, %v161_v18  ;;  %v356_v23 = vpack.c.bf16 %v164_v22, %v163_v21  ;;  %v166_v25 = vld [vmem:[#allocation8 + $0x58] sm:$0xff]  ;;  %v167_v27 = vld [vmem:[#allocation8 + $0x60] sm:$0xff]  ;;  %v168_v28 = vld [vmem:[#allocation8 + $0x68] sm:$0xff] }
  0x3d   :  { %v359_v26 = vpack.c.bf16 %v166_v25, %v165_v24  ;;  %v362_v29 = vpack.c.bf16 %v168_v28, %v167_v27  ;;  %v169_v30 = vld [vmem:[#allocation8 + $0x70] sm:$0xff]  ;;  %v170_v31 = vld [vmem:[#allocation8 + $0x78] sm:$0xff] }
  0x3e   :  { %342 = vmatpush3.bf16.msra.mxu0 %v341_v11  ;;  %v365_v32 = vpack.c.bf16 %v170_v31, %v169_v30  ;;  %v266_v33 = vld [vmem:[%s579_s2] ss:$0 sm:$0xff]  ;;  %s442_s2 = scalar_lea.vmem %s257_s15, 128 }
  0x3f   :  { %348 = vmatpush3.bf16.msra.mxu1 %v347_v13  ;;  %v268_v40 = vld [vmem:[%s582_s5] ss:$0 sm:$0xff]  ;;  %p443_p10 = scmp.ne.s32.totalorder %s257_s15, %s442_s2  ;;  %p448_p12 = scmp.lt.s32.totalorder %s442_s2, %s442_s2 }
  0x40   :  { %349 = vmatprep.subr.bf16.mxu1 %v475_v0 }
  0x41   :  { %300 = vmatmul.mubr.msk.f32.vlgmr.msra.gmra.mrb[0].mxu0 %vm76_vm1, %v64_v16  ;;  %p449_p13 = por %p448_p12, %p447_p11 }
  0x43   :  { %351 = vmatpush3.bf16.msra.mxu1 %v350_v17  ;;  %p450_p0 = pnand %p449_p13, %p443_p10 }
  0x44   :  { %352 = vmatprep.subr.bf16.mxu1 %v475_v0 }
  0x47   :  { %354 = vmatpush3.bf16.msra.mxu1 %v353_v20 }
  0x48   :  { %355 = vmatprep.subr.bf16.mxu1 %v475_v0 }
  0x4b   :  { %357 = vmatpush3.bf16.msra.mxu1 %v356_v23 }
  0x4c   :  { %358 = vmatprep.subr.bf16.mxu1 %v475_v0 }
  0x4f   :  { %360 = vmatpush3.bf16.msra.mxu1 %v359_v26 }
  0x50   :  { %361 = vmatprep.subr.bf16.mxu1 %v475_v0 }
  0x53   :  { %363 = vmatpush3.bf16.msra.mxu1 %v362_v29 }
  0x54   :  { %364 = vmatprep.subr.bf16.mxu1 %v475_v0 }
  0x57   :  { %366 = vmatpush3.bf16.msra.mxu1 %v365_v32 }
 0x114   :  { %v146_v34 = vpop.f32.mrb[0].mxu0 }
 0x115   :  { %v147_v36 = vadd.f32 %v266_v33, %v146_v34  ;;  %v301_v37 = vpop.f32.mrb[1].mxu0 }
 0x117   :  { %v153_v38 = vmul.f32 %v152_v35, %v147_v36  ;;  %vm151_vm2 = vcmp.gt.f32.partialorder %v147_v36, 0.0 }
 0x119   :  { %v154_v39 = vsel %vm151_vm2, %v147_v36, %v153_v38 }
 0x11a   :  { %335 = vmatmul.mubr.f32.vlgmr.msra.gmra.mrb[0].mxu1 %v154_v39 }
 0x1ed   :  { %v244_v41 = vpop.f32.mrb[0].mxu1 }
 0x1ee   :  { %v245_v42 = vadd.f32 %v268_v40, %v244_v41  ;;  %v336_v43 = vpop.f32.mrb[1].mxu1 }
 0x1f0   :  { %249 = vst.msk [vmem:[#allocation9] sm:$0xff] %vm248_vm3, %v245_v42 }
 0x1f1   :  { %453 = shalt.err (!%p450_p0)
}
 0x1f2   :  { %s454_s17 = scalar_lea.hbm %s583_s6, 128 }
 0x1f3   :  { %p455_p1 = scmp.ne.s32.totalorder %s583_s6, %s454_s17  ;;  %p458_p2 = scmp.lt.u32.totalorder %s454_s17, %s583_s6 }
 0x1f5   :  { %p460_p3 = pnand %p458_p2, %p455_p1 }
 0x1f7   :  { %463 = shalt.err (!%p460_p3)
}
 0x1f8   :  { %259 = dma.vmem_to_hbm [thread:$0]  %s257_s15, 128, %s583_s6, [#allocation5]  }
 0x1f9   :  { %468 = dma.done.wait [#allocation5], 128  }
 0x1fa   :  { %469 = vsyncadd [#allocation5], 4294967168 }
 0x1fb   :  { %263 = vsyncpa [#allocation4], 1 }
 0x1fc   :  { %264 = vsyncpa [#allocation7], 1 }
 0x1fd   :  { %265 = vsyncpa [#allocation5], 1 }

</bundles_post_ra>
